<compile_context>
chip_gen: v6e
topology: v6e:2x2x1
jax: 0.10.0
libtpu: 0.0.40
codegen_flags: <defaults>
</compile_context>

<pallas_src>
import functools

import jax
import jax.numpy as jnp
from jax import lax
from jax.experimental import pallas as pl
from jax.experimental.pallas import tpu as pltpu


def _round_up(n, m):
    return (n + m - 1) // m * m


def _default_vmem_limit():
    # Per-generation VMEM budget instead of a hardcoded 48 MiB: ~70% of physical capacity
    # (64 MiB on v7x, 128 MiB on v5e/v6e), leaving headroom for Mosaic internal scratch.
    try:
        cap = pltpu.get_tpu_info().vmem_capacity_bytes
    except Exception:
        cap = 64 * 1024 * 1024        # conservative (v7x-sized) fallback
    return int(cap * 7 // 10)


def _prep_bias(bias, O, O_pad, K):
    b = bias if bias is not None else jnp.zeros((O,), jnp.float32)
    be = (b.astype(jnp.float32) + jnp.float32(K)).reshape(O, 1)   # fold the +C*kh*kw constant
    return jnp.pad(be, ((0, O_pad - O), (0, 0)))                  # (O_pad, 1) f32


# ----------------------------------------------------------------------------- fused path

def _fused_conv_kernel(x_ref, w_ref, b_ref, o_ref, *, kh, kw, Wp, Lf):
    # x_ref: (1, C, (Hp+1)*Wp) raw zero-padded input, spatial flattened, f32
    # w_ref: (kh*kw, O_pad, C) exp(weight), tap-major (constant block across the grid)
    # b_ref: (O_pad, 1)        bias + C*kh*kw, f32 (constant block)
    # o_ref: (1, O_pad, Lf)    f32 output, Lf = Ho*Wp (junk columns at x >= Wo, sliced later)
    ex = jnp.exp(x_ref[0])                 # exp ONCE per input element, f32 (EUP slot)
    exb = ex.astype(w_ref.dtype)           # single cast for the MXU
    o_pad = o_ref.shape[1]
    acc = jnp.zeros((o_pad, Lf), jnp.float32)
    for t in range(kh * kw):               # static unroll: kh*kw shifted 2-D matmuls
        i, j = divmod(t, kw)
        off = i * Wp + j                   # contiguous lane-slice for tap (i, j)
        acc = acc + jnp.dot(w_ref[t], exb[:, off:off + Lf],
                            preferred_element_type=jnp.float32)
    o_ref[0] = (b_ref[...] - acc).astype(o_ref.dtype)


# --------------------------------------------------------------------------- fallback path

def _im2col_kernel(p_ref, w_ref, b_ref, o_ref):
    # p_ref: (1, K, tl) exp'd patches; w_ref: (O_pad, K); b_ref: (O_pad, 1); o_ref: (1, O_pad, tl)
    acc = jnp.dot(w_ref[...], p_ref[0], preferred_element_type=jnp.float32)
    o_ref[0] = (b_ref[...] - acc).astype(o_ref.dtype)


def _im2col_conv2d(x, weight, bias, stride, padding, mxu_dtype, vmem_limit_bytes,
                   lane_tile=8192):
    B, C, H, W = x.shape
    O, _, kh, kw = weight.shape
    K = C * kh * kw
    xp = jnp.pad(x.astype(jnp.float32),
                 ((0, 0), (0, 0), (padding, padding), (padding, padding)))
    ex = jnp.exp(xp).astype(mxu_dtype)
    Ho = (H + 2 * padding - kh) // stride + 1
    Wo = (W + 2 * padding - kw) // stride + 1
    L = Ho * Wo
    # (c, i, j)-major feature order == weight.reshape(O, K) (validated numerically below).
    patches = lax.conv_general_dilated_patches(
        ex, filter_shape=(kh, kw), window_strides=(stride, stride),
        padding="VALID").reshape(B, K, L)

    O_pad = _round_up(O, 8)
    ew = jnp.exp(weight.reshape(O, K).astype(jnp.float32))
    ew = jnp.pad(ew, ((0, O_pad - O), (0, 0))).astype(mxu_dtype)
    bias_eff = _prep_bias(bias, O, O_pad, K)

    itemsize = jnp.dtype(mxu_dtype).itemsize
    budget = int(vmem_limit_bytes * 0.6) - 2 * O_pad * K * itemsize
    per_lane = 2 * (K * itemsize + O_pad * 4)        # double-buffered patch + output columns
    tl_cap = max(128, budget // per_lane // 128 * 128)
    tl = int(min(_round_up(L, 128), lane_tile, tl_cap))
    L_pad = _round_up(L, tl)
    if L_pad != L:
        patches = jnp.pad(patches, ((0, 0), (0, 0), (0, L_pad - L)))

    out = pl.pallas_call(
        _im2col_kernel,
        out_shape=jax.ShapeDtypeStruct((B, O_pad, L_pad), jnp.float32),
        grid_spec=pltpu.PrefetchScalarGridSpec(
            num_scalar_prefetch=0,
            grid=(B, L_pad // tl),
            in_specs=[
                pl.BlockSpec((1, K, tl), lambda b, l: (b, 0, l)),
                pl.BlockSpec((O_pad, K), lambda b, l: (0, 0)),
                pl.BlockSpec((O_pad, 1), lambda b, l: (0, 0)),
            ],
            out_specs=pl.BlockSpec((1, O_pad, tl), lambda b, l: (b, 0, l)),
        ),
        compiler_params=pltpu.CompilerParams(
            dimension_semantics=("parallel", "parallel"),
            vmem_limit_bytes=vmem_limit_bytes,
        ),
    )(patches, ew, bias_eff)
    return out[:, :O, :L].reshape(B, O, Ho, Wo)


# --------------------------------------------------------------------------------- wrapper

def custom_conv2d(x, weight, bias=None, *, stride=1, padding=0,
                  mxu_dtype=jnp.bfloat16, vmem_limit_bytes=None):
    """x: (B,C,H,W); weight: (O,C,kh,kw); bias: (O,) or None. Returns (B,O,Ho,Wo) f32."""
    B, C, H, W = x.shape
    O, _, kh, kw = weight.shape
    K = C * kh * kw
    if vmem_limit_bytes is None:
        vmem_limit_bytes = _default_vmem_limit()
    if stride != 1:
        # TODO(synk): fuse patch extraction for stride > 1 too (phase-decompose the padded
        # input in the wrapper); until then use the validated im2col-fed matmul kernel.
        return _im2col_conv2d(x, weight, bias, stride, padding, mxu_dtype, vmem_limit_bytes)

    Hp, Wp = H + 2 * padding, W + 2 * padding
    Ho, Wo = Hp - kh + 1, Wp - kw + 1
    Lf = Ho * Wp                      # row-flattened output length (junk cols x in [Wo, Wp))
    Lin = (Hp + 1) * Wp               # +1 zero row keeps every tap slice in bounds
    O_pad = _round_up(O, 8)
    T = kh * kw

    # Zero-pad BEFORE exp (padded taps must contribute exp(0 + w), matching F.unfold);
    # exp itself happens inside the kernel so the exp'd input never round-trips HBM.
    xp = jnp.pad(x.astype(jnp.float32),
                 ((0, 0), (0, 0), (padding, padding + 1), (padding, padding)))
    xflat = xp.reshape(B, C, Lin)

    # Tiny constant operands, computed once in the wrapper.
    ew = jnp.exp(weight.astype(jnp.float32)).transpose(2, 3, 0, 1).reshape(T, O, C)
    ew = jnp.pad(ew, ((0, 0), (0, O_pad - O), (0, 0))).astype(mxu_dtype)
    bias_eff = _prep_bias(bias, O, O_pad, K)

    kernel = functools.partial(_fused_conv_kernel, kh=kh, kw=kw, Wp=Wp, Lf=Lf)

    # Grid = one step per batch image: each step DMAs the whole raw (C, Hp, Wp) slab and the
    # (O_pad, Ho*Wp) output tile -- the largest per-step transfer the problem allows, which
    # amortizes the ~0.35us/step pipeline overhead. "parallel" shards batches over v7x's 2 TCs.
    # TODO(synk): for B == 1 with large images, add a row-tile grid axis with a (kh-1)-row halo
    #             via manual double-buffered DMA (keeps the 2nd TC busy and fits v7x's 64 MiB).
    # NOTE: ew / bias_eff have constant index maps; they are tiny here, but for large O*K give
    #       them pipeline_mode=pl.Buffered(1) so the wasted second buffer is dropped.
    out = pl.pallas_call(
        kernel,
        out_shape=jax.ShapeDtypeStruct((B, O_pad, Lf), jnp.float32),
        grid_spec=pltpu.PrefetchScalarGridSpec(
            num_scalar_prefetch=0,
            grid=(B,),
            in_specs=[
                pl.BlockSpec((1, C, Lin), lambda b: (b, 0, 0)),      # raw padded input slab
                pl.BlockSpec((T, O_pad, C), lambda b: (0, 0, 0)),    # exp'd weights (resident)
                pl.BlockSpec((O_pad, 1), lambda b: (0, 0)),          # bias_eff (resident)
            ],
            out_specs=pl.BlockSpec((1, O_pad, Lf), lambda b: (b, 0, 0)),
        ),
        compiler_params=pltpu.CompilerParams(
            dimension_semantics=("parallel",),
            vmem_limit_bytes=vmem_limit_bytes,
        ),
    )(xflat, ew, bias_eff)

    # Output is already O-major; drop O padding and junk columns (output-sized copy only).
    return out.reshape(B, O_pad, Ho, Wp)[:, :O, :, :Wo]


# ------------------------------------------------------------------------------- reference

def _reference(x, weight, bias, stride, padding):
    """Pure-JAX restatement of the PyTorch forward (independent of the kernel path)."""
    B, C, H, W = x.shape
    O, _, kh, kw = weight.shape
    xp = jnp.pad(x, ((0, 0), (0, 0), (padding, padding), (padding, padding)))
    Ho = (H + 2 * padding - kh) // stride + 1
    Wo = (W + 2 * padding - kw) // stride + 1
    cols = []
    for i in range(kh):
        for j in range(kw):
            cols.append(xp[:, :, i:i + stride * Ho:stride, j:j + stride * Wo:stride])
    p = jnp.stack(cols, axis=0).reshape(kh, kw, B, C, Ho, Wo)
    p = p.transpose(2, 4, 5, 3, 0, 1)                       # (B, Ho, Wo, C, kh, kw)
    ws = p[:, :, :, None] + weight[None, None, None]        # (B, Ho, Wo, O, C, kh, kw)
    s = (1.0 - jnp.exp(ws)).sum(axis=(4, 5, 6))             # (B, Ho, Wo, O)
    out = s.transpose(0, 3, 1, 2)
    if bias is not None:
        out = out + bias.reshape(1, -1, 1, 1)
    return out


if __name__ == "__main__":
    key = jax.random.PRNGKey(0)
    kx, kw_ = jax.random.split(key)

    B, C, H, W = 2, 4, 16, 16
    O, ksize = 8, 3

    x = jax.random.normal(kx, (B, C, H, W), dtype=jnp.float32) * 0.1
    weight = jax.random.normal(kw_, (O, C, ksize, ksize), dtype=jnp.float32) * 0.1
    bias = jnp.zeros((O,), dtype=jnp.float32)

    # Fused path (stride=1, padding=1), f32 MXU operands: exact check.
    ref = _reference(x, weight, bias, stride=1, padding=1)
    out_f32 = jax.block_until_ready(
        custom_conv2d(x, weight, bias, stride=1, padding=1, mxu_dtype=jnp.float32))
    assert out_f32.shape == (B, O, H, W), out_f32.shape
    assert jnp.allclose(out_f32, ref, atol=1e-4, rtol=1e-4), (
        float(jnp.max(jnp.abs(out_f32 - ref))))

    # Fused path, default bf16 MXU operands (f32 accumulation): loose check.
    out_bf16 = jax.block_until_ready(
        custom_conv2d(x, weight, bias, stride=1, padding=1))
    assert out_bf16.shape == (B, O, H, W), out_bf16.shape
    assert jnp.allclose(out_bf16, ref, atol=0.2), (
        float(jnp.max(jnp.abs(out_bf16 - ref))))

    # Stride > 1 fallback path (also locks in the im2col (c,i,j) feature-order assumption).
    ref2 = _reference(x, weight, bias, stride=2, padding=1)
    out_s2 = jax.block_until_ready(
        custom_conv2d(x, weight, bias, stride=2, padding=1, mxu_dtype=jnp.float32))
    assert out_s2.shape == (B, O, 8, 8), out_s2.shape
    assert jnp.allclose(out_s2, ref2, atol=1e-4, rtol=1e-4), (
        float(jnp.max(jnp.abs(out_s2 - ref2))))

    print("KERNEL_OK")
</pallas_src>

<mosaic_0001>
module attributes {stable_mosaic.version = 11 : i64} {
  func.func @_fused_conv_kernel(%arg0: i32, %arg1: memref<1x4x342xf32, #tpu.memory_space<vmem>>, %arg2: memref<9x8x4xf32, #tpu.memory_space<vmem>>, %arg3: memref<8x1xf32, #tpu.memory_space<vmem>>, %arg4: memref<1x8x288xf32, #tpu.memory_space<vmem>>) attributes {dimension_semantics = [#tpu.dimension_semantics<parallel>], iteration_bounds = array<i64: 2>, scalar_prefetch = 0 : i64, scratch_operands = 0 : i64, tpu.core_type = #tpu.core_type<tc>, window_params = [{transform_indices = @transform_0, window_bounds = array<i64: 1, 4, 342>}, {pipeline_mode = #tpu.pipeline_mode<synchronous>, transform_indices = @transform_1, window_bounds = array<i64: 9, 8, 4>}, {pipeline_mode = #tpu.pipeline_mode<synchronous>, transform_indices = @transform_2, window_bounds = array<i64: 8, 1>}, {transform_indices = @transform_3, window_bounds = array<i64: 1, 8, 288>}]} {
    %c0 = arith.constant 0 : index
    %c0_0 = arith.constant 0 : index
    %c0_1 = arith.constant 0 : index
    %0 = vector.load %arg1[%c0, %c0_0, %c0_1] : memref<1x4x342xf32, #tpu.memory_space<vmem>>, vector<1x4x342xf32>
    %1 = vector.shape_cast %0 : vector<1x4x342xf32> to vector<4x342xf32>
    %2 = math.exp %1 : vector<4x342xf32>
    %cst = arith.constant 0.000000e+00 : f32
    %3 = vector.broadcast %cst : f32 to vector<8x288xf32>
    %c0_2 = arith.constant 0 : index
    %c0_3 = arith.constant 0 : index
    %c0_4 = arith.constant 0 : index
    %4 = vector.load %arg2[%c0_2, %c0_3, %c0_4] : memref<9x8x4xf32, #tpu.memory_space<vmem>>, vector<1x8x4xf32>
    %5 = vector.shape_cast %4 : vector<1x8x4xf32> to vector<8x4xf32>
    %6 = vector.extract_strided_slice %2 {offsets = [0, 0], sizes = [4, 288], strides = [1, 1]} : vector<4x342xf32> to vector<4x288xf32>
    %cst_5 = arith.constant dense<0.000000e+00> : vector<8x288xf32>
    %7 = tpu.matmul %5, %6, %cst_5 {dimension_numbers = #tpu.dot_dimension_numbers<[1], [0], [0], [1], [0, 0, 1, 1], [], []>} : vector<8x4xf32>, vector<4x288xf32>, vector<8x288xf32> -> vector<8x288xf32>
    %8 = arith.addf %3, %7 : vector<8x288xf32>
    %c1 = arith.constant 1 : index
    %c0_6 = arith.constant 0 : index
    %c0_7 = arith.constant 0 : index
    %9 = vector.load %arg2[%c1, %c0_6, %c0_7] : memref<9x8x4xf32, #tpu.memory_space<vmem>>, vector<1x8x4xf32>
    %10 = vector.shape_cast %9 : vector<1x8x4xf32> to vector<8x4xf32>
    %11 = vector.extract_strided_slice %2 {offsets = [0, 1], sizes = [4, 288], strides = [1, 1]} : vector<4x342xf32> to vector<4x288xf32>
    %cst_8 = arith.constant dense<0.000000e+00> : vector<8x288xf32>
    %12 = tpu.matmul %10, %11, %cst_8 {dimension_numbers = #tpu.dot_dimension_numbers<[1], [0], [0], [1], [0, 0, 1, 1], [], []>} : vector<8x4xf32>, vector<4x288xf32>, vector<8x288xf32> -> vector<8x288xf32>
    %13 = arith.addf %8, %12 : vector<8x288xf32>
    %c2 = arith.constant 2 : index
    %c0_9 = arith.constant 0 : index
    %c0_10 = arith.constant 0 : index
    %14 = vector.load %arg2[%c2, %c0_9, %c0_10] : memref<9x8x4xf32, #tpu.memory_space<vmem>>, vector<1x8x4xf32>
    %15 = vector.shape_cast %14 : vector<1x8x4xf32> to vector<8x4xf32>
    %16 = vector.extract_strided_slice %2 {offsets = [0, 2], sizes = [4, 288], strides = [1, 1]} : vector<4x342xf32> to vector<4x288xf32>
    %cst_11 = arith.constant dense<0.000000e+00> : vector<8x288xf32>
    %17 = tpu.matmul %15, %16, %cst_11 {dimension_numbers = #tpu.dot_dimension_numbers<[1], [0], [0], [1], [0, 0, 1, 1], [], []>} : vector<8x4xf32>, vector<4x288xf32>, vector<8x288xf32> -> vector<8x288xf32>
    %18 = arith.addf %13, %17 : vector<8x288xf32>
    %c3 = arith.constant 3 : index
    %c0_12 = arith.constant 0 : index
    %c0_13 = arith.constant 0 : index
    %19 = vector.load %arg2[%c3, %c0_12, %c0_13] : memref<9x8x4xf32, #tpu.memory_space<vmem>>, vector<1x8x4xf32>
    %20 = vector.shape_cast %19 : vector<1x8x4xf32> to vector<8x4xf32>
    %21 = vector.extract_strided_slice %2 {offsets = [0, 18], sizes = [4, 288], strides = [1, 1]} : vector<4x342xf32> to vector<4x288xf32>
    %cst_14 = arith.constant dense<0.000000e+00> : vector<8x288xf32>
    %22 = tpu.matmul %20, %21, %cst_14 {dimension_numbers = #tpu.dot_dimension_numbers<[1], [0], [0], [1], [0, 0, 1, 1], [], []>} : vector<8x4xf32>, vector<4x288xf32>, vector<8x288xf32> -> vector<8x288xf32>
    %23 = arith.addf %18, %22 : vector<8x288xf32>
    %c4 = arith.constant 4 : index
    %c0_15 = arith.constant 0 : index
    %c0_16 = arith.constant 0 : index
    %24 = vector.load %arg2[%c4, %c0_15, %c0_16] : memref<9x8x4xf32, #tpu.memory_space<vmem>>, vector<1x8x4xf32>
    %25 = vector.shape_cast %24 : vector<1x8x4xf32> to vector<8x4xf32>
    %26 = vector.extract_strided_slice %2 {offsets = [0, 19], sizes = [4, 288], strides = [1, 1]} : vector<4x342xf32> to vector<4x288xf32>
    %cst_17 = arith.constant dense<0.000000e+00> : vector<8x288xf32>
    %27 = tpu.matmul %25, %26, %cst_17 {dimension_numbers = #tpu.dot_dimension_numbers<[1], [0], [0], [1], [0, 0, 1, 1], [], []>} : vector<8x4xf32>, vector<4x288xf32>, vector<8x288xf32> -> vector<8x288xf32>
    %28 = arith.addf %23, %27 : vector<8x288xf32>
    %c5 = arith.constant 5 : index
    %c0_18 = arith.constant 0 : index
    %c0_19 = arith.constant 0 : index
    %29 = vector.load %arg2[%c5, %c0_18, %c0_19] : memref<9x8x4xf32, #tpu.memory_space<vmem>>, vector<1x8x4xf32>
    %30 = vector.shape_cast %29 : vector<1x8x4xf32> to vector<8x4xf32>
    %31 = vector.extract_strided_slice %2 {offsets = [0, 20], sizes = [4, 288], strides = [1, 1]} : vector<4x342xf32> to vector<4x288xf32>
    %cst_20 = arith.constant dense<0.000000e+00> : vector<8x288xf32>
    %32 = tpu.matmul %30, %31, %cst_20 {dimension_numbers = #tpu.dot_dimension_numbers<[1], [0], [0], [1], [0, 0, 1, 1], [], []>} : vector<8x4xf32>, vector<4x288xf32>, vector<8x288xf32> -> vector<8x288xf32>
    %33 = arith.addf %28, %32 : vector<8x288xf32>
    %c6 = arith.constant 6 : index
    %c0_21 = arith.constant 0 : index
    %c0_22 = arith.constant 0 : index
    %34 = vector.load %arg2[%c6, %c0_21, %c0_22] : memref<9x8x4xf32, #tpu.memory_space<vmem>>, vector<1x8x4xf32>
    %35 = vector.shape_cast %34 : vector<1x8x4xf32> to vector<8x4xf32>
    %36 = vector.extract_strided_slice %2 {offsets = [0, 36], sizes = [4, 288], strides = [1, 1]} : vector<4x342xf32> to vector<4x288xf32>
    %cst_23 = arith.constant dense<0.000000e+00> : vector<8x288xf32>
    %37 = tpu.matmul %35, %36, %cst_23 {dimension_numbers = #tpu.dot_dimension_numbers<[1], [0], [0], [1], [0, 0, 1, 1], [], []>} : vector<8x4xf32>, vector<4x288xf32>, vector<8x288xf32> -> vector<8x288xf32>
    %38 = arith.addf %33, %37 : vector<8x288xf32>
    %c7 = arith.constant 7 : index
    %c0_24 = arith.constant 0 : index
    %c0_25 = arith.constant 0 : index
    %39 = vector.load %arg2[%c7, %c0_24, %c0_25] : memref<9x8x4xf32, #tpu.memory_space<vmem>>, vector<1x8x4xf32>
    %40 = vector.shape_cast %39 : vector<1x8x4xf32> to vector<8x4xf32>
    %41 = vector.extract_strided_slice %2 {offsets = [0, 37], sizes = [4, 288], strides = [1, 1]} : vector<4x342xf32> to vector<4x288xf32>
    %cst_26 = arith.constant dense<0.000000e+00> : vector<8x288xf32>
    %42 = tpu.matmul %40, %41, %cst_26 {dimension_numbers = #tpu.dot_dimension_numbers<[1], [0], [0], [1], [0, 0, 1, 1], [], []>} : vector<8x4xf32>, vector<4x288xf32>, vector<8x288xf32> -> vector<8x288xf32>
    %43 = arith.addf %38, %42 : vector<8x288xf32>
    %c8 = arith.constant 8 : index
    %c0_27 = arith.constant 0 : index
    %c0_28 = arith.constant 0 : index
    %44 = vector.load %arg2[%c8, %c0_27, %c0_28] : memref<9x8x4xf32, #tpu.memory_space<vmem>>, vector<1x8x4xf32>
    %45 = vector.shape_cast %44 : vector<1x8x4xf32> to vector<8x4xf32>
    %46 = vector.extract_strided_slice %2 {offsets = [0, 38], sizes = [4, 288], strides = [1, 1]} : vector<4x342xf32> to vector<4x288xf32>
    %cst_29 = arith.constant dense<0.000000e+00> : vector<8x288xf32>
    %47 = tpu.matmul %45, %46, %cst_29 {dimension_numbers = #tpu.dot_dimension_numbers<[1], [0], [0], [1], [0, 0, 1, 1], [], []>} : vector<8x4xf32>, vector<4x288xf32>, vector<8x288xf32> -> vector<8x288xf32>
    %48 = arith.addf %43, %47 : vector<8x288xf32>
    %c0_30 = arith.constant 0 : index
    %c0_31 = arith.constant 0 : index
    %49 = vector.load %arg3[%c0_30, %c0_31] : memref<8x1xf32, #tpu.memory_space<vmem>>, vector<8x1xf32>
    %50 = vector.broadcast %49 : vector<8x1xf32> to vector<8x288xf32>
    %51 = arith.subf %50, %48 : vector<8x288xf32>
    %c0_32 = arith.constant 0 : index
    %c0_33 = arith.constant 0 : index
    %c0_34 = arith.constant 0 : index
    %52 = vector.load %arg4[%c0_32, %c0_33, %c0_34] : memref<1x8x288xf32, #tpu.memory_space<vmem>>, vector<1x8x288xf32>
    %53 = vector.shape_cast %52 : vector<1x8x288xf32> to vector<8x288xf32>
    %54 = vector.shape_cast %51 : vector<8x288xf32> to vector<1x8x288xf32>
    tpu.vector_store %arg4[%c0_32, %c0_33, %c0_34], %54 {strides = array<i32>} : memref<1x8x288xf32, #tpu.memory_space<vmem>>, vector<1x8x288xf32>,
    return
  }
  func.func @transform_0(%arg0: i32) -> (i32, i32, i32) {
    %c0_i32 = arith.constant 0 : i32
    %c0_i32_0 = arith.constant 0 : i32
    %c0_i32_1 = arith.constant 0 : i32
    return %arg0, %c0_i32, %c0_i32_0 : i32, i32, i32
  }
  func.func @transform_1(%arg0: i32) -> (i32, i32, i32) {
    %c0_i32 = arith.constant 0 : i32
    %c0_i32_0 = arith.constant 0 : i32
    %c0_i32_1 = arith.constant 0 : i32
    %c0_i32_2 = arith.constant 0 : i32
    return %c0_i32, %c0_i32_0, %c0_i32_1 : i32, i32, i32
  }
  func.func @transform_2(%arg0: i32) -> (i32, i32) {
    %c0_i32 = arith.constant 0 : i32
    %c0_i32_0 = arith.constant 0 : i32
    %c0_i32_1 = arith.constant 0 : i32
    return %c0_i32, %c0_i32_0 : i32, i32
  }
  func.func @transform_3(%arg0: i32) -> (i32, i32, i32) {
    %c0_i32 = arith.constant 0 : i32
    %c0_i32_0 = arith.constant 0 : i32
    %c0_i32_1 = arith.constant 0 : i32
    return %arg0, %c0_i32, %c0_i32_0 : i32, i32, i32
  }
}

</mosaic_0001>

<bundles_post_ra>
// kernel: tpu_custom_call.1
= control target key start
LH: loop header
LB: loop body
LE: loop exit
PB: predicated region body
PF: predicated region fallthrough
CT: control target
= control target key end

     0   :  { %8 = vsyncpa [#allocation3], 0  ;;  %s2233_s0 = inlined_call_operand.vmem [shape: f32[2,4,342], index: 0, kind: input, shape index: {}]   ;;  %s2234_s1 = inlined_call_operand.vmem [shape: f32[9,8,4], index: 1, kind: input, shape index: {}]   ;;  %s2235_s2 = inlined_call_operand.vmem [shape: f32[8,1], index: 2, kind: input, shape index: {}]   ;;  %s2236_s3 = inlined_call_operand.hbm [shape: f32[2,8,288], index: 3, kind: output, shape index: {}]  }
   0x1   :  { %10 = vsyncpa [#allocation3 + $0x1], 0  ;;  %s2003_s12 = smov 0   ;;  %s2005_s13 = smov 0  }
   0x2   :  { %s2007_s14 = smov 0   ;;  %s2009_s15 = smov 0  }
   0x3 LB: > { %s2024_s16 = sadd.s32 4294967295, %s1969_s15   ;;  %s1727_s17 = sadd.s32 4294967294, %s1969_s15   ;;  %s1969_s15 = sphi %s2009_s15, %s2242_s15   ;;  %s1965_s14 = sphi %s2007_s14, %s2241_s14   ;;  %s1961_s13 = sphi %s2005_s13, %s2240_s13   ;;  %s1957_s12 = sphi %s2003_s12, %s2239_s12  }
   0x4   : > { %s2028_s18 = sadd.s32 1, %s1969_s15   ;;  %s91_s19 = sadd.s32 1, %s1965_s14 }
   0x5   : > { %s88_s20 = ssub.s32 %s1969_s15, %s2028_s18  ;;  %p101_p0 = scmp.ne.s32.totalorder %s1965_s14, %s1961_s13 }
   0x6   : > { %p89_p1 = scmp.eq.s32.totalorder %s88_s20, 0  ;;  %p102_p2 = scmp.eq.s32.totalorder %s2024_s16, 1 }
   0x7   : > { %p107_p3 = scmp.ne.s32.totalorder %s1961_s13, %s1957_s12  ;;  %p108_p4 = scmp.eq.s32.totalorder %s1727_s17, 1 }
   0x8   : > { %s2039_s21 = scalar_select %p89_p1, %s1965_s14, %s91_s19  }
   0x9   : > { %p2041_p5 = por %p102_p2, %p101_p0  ;;  %p2045_p6 = por %p108_p4, %p107_p3 }
   0xa   : > { %p1730_p7 = scmp.ge.s32.totalorder %s1969_s15, 1  ;;  %p140_p8 = scmp.lt.s32.totalorder %s1969_s15, 3 }
   0xc   : > { %p141_p9 = pnand %p1730_p7, %p140_p8 }
   0xd   : > { %p164_p10 = scmp.lt.s32.totalorder (!%p141_p9), %s2024_s16, 1  ;;  %s1973_s29 = smov (!%p141_p9), 127  }
   0xe   : > { %144 = sbr.rel (%p141_p9) target bundleno = 415 (0x19f), region = 32  ;;  %s1974_s30 = smov (!%p141_p9), 126  }
   0xf   : > { %s1975_s4 = smov (!%p141_p9), 110   ;;  %s1976_s5 = smov (!%p141_p9), 109  }
  0x10   : > { %s1977_s6 = smov (!%p141_p9), 108   ;;  %s1978_s7 = smov (!%p141_p9), 92  }
  0x11   : > { %s1980_s8 = smov (!%p141_p9), 91   ;;  %s1981_s9 = smov (!%p141_p9), 90  }
  0x12   : > { %s161_s17 = sand.u32 (!%p141_p9), 1, %s1961_s13   ;;  %s1853_s20 = smul.u32 (!%p141_p9), 384, %s2024_s16 }
  0x13   : > { %v1971_v0 = vmov 0.0   ;;  %s165_s24 = scalar_select %p164_p10, %s2024_s16, 1  ;;  %vm1972_vm0 = vmmov 0   ;;  %v1979_v8 = vmov 0   ;;  %v1640_v9 = vld [vmem:[%s2235_s2] sm:$0xff]  ;;  %vm194_vm1 = vcmask 1043456  }
  0x14   : > { %1806 = vmatprep.subr.mxu1 %v1971_v0  ;;  %265 = vmatprep.mubr.f32.mxu0 %v1971_v0  ;;  %v1732_v10 = vld [vmem:[%s2234_s1 + $0x8] sm:$0xff]  ;;  %vm190_vm2 = vcmask 31744   ;;  %v175_v13 = vld [vmem:[%s2234_s1] sm:$0xff]  ;;  %v1743_v16 = vld [vmem:[%s2234_s1 + $0x10] sm:$0xff]  ;;  %vm187_vm3 = vcmask 1039360   ;;  %vm500_vm4 = vcmask 1031168  }
  0x15   : > { %s1852_s25 = smul.u32 12, %s165_s24  ;;  %1808 = vmatprep.mubr.msk.f32.mxu1 %vm1972_vm0, %v1971_v0  ;;  %1904 = vset.pattern.permute.xlu0 %v1979_v8  ;;  %v1749_v19 = vld [vmem:[%s2234_s1 + $0x18] sm:$0xff]  ;;  %v1755_v25 = vld [vmem:[%s2234_s1 + $0x20] sm:$0xff]  ;;  %vm664_vm5 = vcmask 900096   ;;  %v1761_v30 = vld [vmem:[%s2234_s1 + $0x28] sm:$0xff]  ;;  %vm828_vm6 = vcmask 891904  }
  0x16   : > { %vm992_vm7 = vcmask 883712   ;;  %vm1156_vm8 = vcmask 752640   ;;  %v1767_v41 = vld [vmem:[%s2234_s1 + $0x30] sm:$0xff]  ;;  %vm1320_vm9 = vcmask 744448   ;;  %v1773_v48 = vld [vmem:[%s2234_s1 + $0x38] sm:$0xff]  ;;  %vm1484_vm10 = vcmask 736256  }
  0x17   : > { %s168_s28 = scalar_lea.vmem %s2233_s0, %s1852_s25  ;;  %v1779_v54 = vld [vmem:[%s2234_s1 + $0x40] sm:$0xff]  ;;  %s1851_s19 = smul.u32 24, %s161_s17  ;;  %vm1651_vm11 = vcmask 261120  }
  0x18   : > { %v170_v1 = vld [vmem:[%s168_s28 + $0x8] sm:$0xf]  ;;  %v169_v2 = vld [vmem:[%s168_s28] sm:$0xff]  ;;  %s1666_s28 = scalar_lea.hbm %s2236_s3, %s1853_s20  ;;  %s1982_s16 = smov [#allocation2]  }
  0x19   : > { %v173_v3 = vmul.f32 1.442695, %v170_v1  ;;  %v171_v4 = vmul.f32 1.442695, %v169_v2  ;;  %s163_s24 = scalar_lea.vmem [#allocation2], %s1851_s19 }
  0x1a   : > { %s1668_s25 = sshll.u32 %s163_s24, 4  ;;  %s1669_s25 = int_to_ptr.vmem [resolvable:$true] %s1668_s25 }
  0x1b   : > { %1905 = vpow2.f32 %v173_v3 }
  0x1c   : > { %1907 = vpow2.f32 %v171_v4 }
  0x28   : > { %v1906_v5 = vpop.eup %1905 }
  0x29   : > { %v2060_v6 = vpop.eup %1907  ;;  %185 = vrot.lane.b32.xlu0 %v1906_v5, %s1973_s29 }
  0x2a   : > { %181 = vrot.lane.b32.xlu1 %v2060_v6, %s1973_s29  ;;  %v2067_v7 = vcombine.high %v2060_v6, %v2060_v6 }
  0x2d   : > { %498 = vrot.lane.b32.xlu0 %v1906_v5, %s1974_s30 }
  0x2e   : > { %494 = vrot.lane.b32.xlu1 %v2060_v6, %s1974_s30 }
  0x31   : > { %658 = vrot.lane.b32.xlu0 %v2060_v6, %s1975_s4 }
  0x32   : > { %662 = vrot.lane.b32.xlu1 %v1906_v5, %s1975_s4 }
  0x35   : > { %183 = vrot.lane.b32.xlu0 %v2067_v7, %s1973_s29  ;;  %s1654_s29 = scalar_lea.sflag [#allocation3], %s161_s17 }
  0x36   : > { %822 = vrot.lane.b32.xlu1 %v2060_v6, %s1976_s5 }
  0x39   : > { %826 = vrot.lane.b32.xlu0 %v1906_v5, %s1976_s5 }
  0x3a   : > { %496 = vrot.lane.b32.xlu1 %v2067_v7, %s1974_s30  ;;  %s1909_s30 = scalar_lea.vmem %s1669_s25, 384 }
  0x3b   : > { %p1910_p11 = scmp.ne.s32.totalorder %s1669_s25, %s1909_s30 }
  0x3d   : > { %660 = vrot.lane.b32.xlu0 %v2067_v7, %s1975_s4  ;;  %p1911_p12 = pnand %p1910_p11, %p2041_p5  ;;  %s1913_s4 = sshll.u32 %s1982_s16, 4  ;;  %s1914_s4 = int_to_ptr.vmem [resolvable:$false] %s1913_s4 }
  0x3e   : > { %990 = vrot.lane.b32.xlu1 %v1906_v5, %s1977_s6  ;;  %p1916_p0 = scmp.lt.s32.totalorder %s1669_s25, %s1914_s4 }
  0x3f   : > { %p1912_p13 = pneg %p1911_p12 }
  0x41   : > { %988 = vrot.lane.b32.xlu0 %v2067_v7, %s1977_s6 }
  0x42   : > { %824 = vrot.lane.b32.xlu1 %v2067_v7, %s1976_s5  ;;  %s1915_s5 = scalar_lea.vmem %s1914_s4, 768 }
  0x43   : > { %p1917_p1 = scmp.lt.s32.totalorder %s1915_s5, %s1909_s30 }
  0x45   : > { %986 = vrot.lane.b32.xlu0 %v2060_v6, %s1977_s6  ;;  %p1918_p2 = por %p1917_p1, %p1916_p0 }
  0x46   : > { %1152 = vrot.lane.b32.xlu1 %v2067_v7, %s1978_s7 }
  0x47   : > { %p1919_p3 = pnand %p1918_p2, %p1912_p13 }
  0x49   : > { %1154 = vrot.lane.b32.xlu0 %v1906_v5, %s1978_s7 }
  0x4a   : > { %1150 = vrot.lane.b32.xlu1 %v2060_v6, %s1978_s7 }
  0x4d   : > { %1316 = vrot.lane.b32.xlu0 %v2067_v7, %s1980_s8 }
  0x4e   : > { %1318 = vrot.lane.b32.xlu1 %v1906_v5, %s1980_s8 }
  0x51   : > { %1314 = vrot.lane.b32.xlu0 %v2060_v6, %s1980_s8 }
  0x52   : > { %1480 = vrot.lane.b32.xlu1 %v2067_v7, %s1981_s9 }
  0x55   : > { %1482 = vrot.lane.b32.xlu0 %v1906_v5, %s1981_s9 }
  0x56   : > { %1478 = vrot.lane.b32.xlu1 %v2060_v6, %s1981_s9 }
  0x59   : > { %1643 = vperm.xlu0 %1904, %v1640_v9  }
  0x9b   : > { %v186_v11 = vpop.permute.xlu0 %185 }
  0x9c   : > { %v182_v12 = vpop.permute.xlu1 %181  ;;  %1807 = vmatpush3.msk.msra.mxu1 %vm194_vm1, %v186_v11 }
  0x9d   : > { %1809 = vmatmul.mubr.msk.f32.vlgmr.msra.gmra.mxu1 %vm190_vm2, %v1732_v10  ;;  %1811 = vmatprep.subr.mxu1 %v1971_v0 }
  0x9e   : > { %1812 = vmatpush3.msk.msra.mxu1 %vm194_vm1, %v1906_v5  ;;  %1813 = vmatprep.mubr.msk.f32.mxu1 %vm1972_vm0, %v1971_v0 }
  0x9f   : > { %v499_v14 = vpop.permute.xlu0 %498  ;;  %1816 = vmatprep.subr.mxu1 %v1971_v0 }
  0xa0   : > { %v495_v15 = vpop.permute.xlu1 %494 }
  0xa1   : > { %1814 = vmatmul.mubr.msk.f32.vlgmr.msra.gmra.mxu1 %vm190_vm2, %v175_v13 }
  0xa2   : > { %1817 = vmatpush3.msk.msra.mxu1 %vm194_vm1, %v499_v14  ;;  %1818 = vmatprep.mubr.msk.f32.mxu1 %vm1972_vm0, %v1971_v0 }
  0xa3   : > { %v659_v17 = vpop.permute.xlu0 %658  ;;  %1821 = vmatprep.subr.mxu1 %v1971_v0 }
  0xa4   : > { %v663_v18 = vpop.permute.xlu1 %662 }
  0xa5   : > { %1819 = vmatmul.mubr.msk.f32.vlgmr.msra.gmra.mxu1 %vm190_vm2, %v1743_v16 }
  0xa6   : > { %1822 = vmatpush3.msk.msra.mxu1 %vm194_vm1, %v663_v18  ;;  %1823 = vmatprep.mubr.msk.f32.mxu1 %vm1972_vm0, %v1971_v0 }
  0xa7   : > { %v184_v20 = vpop.permute.xlu0 %183  ;;  %1826 = vmatprep.subr.mxu1 %v1971_v0 }
  0xa8   : > { %v823_v21 = vpop.permute.xlu1 %822  ;;  %v189_v22 = vsel %vm187_vm3, %v184_v20, %v186_v11  ;;  %v188_v23 = vsel %vm187_vm3, %v182_v12, %v184_v20 }
  0xa9   : > { %1733 = vmatprep.subr.msk.mxu0 %vm194_vm1, %v189_v22  ;;  %1824 = vmatmul.mubr.msk.f32.vlgmr.msra.gmra.mxu1 %vm190_vm2, %v1749_v19 }
  0xaa   : > { %1734 = vmatpush1.msk.msra.mxu0 %vm194_vm1, %v188_v23  ;;  %1828 = vmatprep.mubr.msk.f32.mxu1 %vm1972_vm0, %v1971_v0 }
  0xab   : > { %1735 = vmatmul.mubr.msk.f32.vlgmr.msra.gmra.mxu0 %vm190_vm2, %v1732_v10  ;;  %1738 = vmatprep.subr.msk.mxu0 %vm194_vm1, %v2067_v7  ;;  %v827_v24 = vpop.permute.xlu0 %826 }
  0xac   : > { %v497_v26 = vpop.permute.xlu1 %496  ;;  %1739 = vmatpush1.msk.msra.mxu0 %vm194_vm1, %v2060_v6  ;;  %1827 = vmatpush3.msk.msra.mxu1 %vm194_vm1, %v827_v24 }
  0xad   : > { %v502_v27 = vsel %vm500_vm4, %v497_v26, %v499_v14  ;;  %415 = vmatprep.mubr.f32.mxu0 %v1971_v0  ;;  %1831 = vmatprep.subr.mxu1 %v1971_v0  ;;  %v501_v28 = vsel %vm500_vm4, %v495_v15, %v497_v26 }
  0xae   : > { %1744 = vmatprep.subr.msk.mxu0 %vm194_vm1, %v502_v27  ;;  %1829 = vmatmul.mubr.msk.f32.vlgmr.msra.gmra.mxu1 %vm190_vm2, %v1755_v25 }
  0xaf   : > { %1740 = vmatmul.mubr.msk.f32.vlgmr.msra.gmra.mxu0 %vm190_vm2, %v175_v13  ;;  %v661_v29 = vpop.permute.xlu0 %660  ;;  %1833 = vmatprep.mubr.msk.f32.mxu1 %vm1972_vm0, %v1971_v0 }
  0xb0   : > { %v991_v31 = vpop.permute.xlu1 %990  ;;  %1745 = vmatpush1.msk.msra.mxu0 %vm194_vm1, %v501_v28  ;;  %v666_v32 = vsel %vm664_vm5, %v661_v29, %v663_v18  ;;  %576 = vmatprep.mubr.f32.mxu0 %v1971_v0  ;;  %v665_v33 = vsel %vm664_vm5, %v659_v17, %v661_v29 }
  0xb1   : > { %1750 = vmatprep.subr.msk.mxu0 %vm194_vm1, %v666_v32  ;;  %1832 = vmatpush3.msk.msra.mxu1 %vm194_vm1, %v991_v31 }
  0xb2   : > { %1834 = vmatmul.mubr.msk.f32.vlgmr.msra.gmra.mxu1 %vm190_vm2, %v1761_v30  ;;  %1836 = vmatprep.subr.mxu1 %v1971_v0 }
  0xb3   : > { %1746 = vmatmul.mubr.msk.f32.vlgmr.msra.gmra.mxu0 %vm190_vm2, %v1743_v16  ;;  %v989_v34 = vpop.permute.xlu0 %988  ;;  %1838 = vmatprep.mubr.msk.f32.mxu1 %vm1972_vm0, %v1971_v0 }
  0xb4   : > { %v825_v35 = vpop.permute.xlu1 %824  ;;  %1751 = vmatpush1.msk.msra.mxu0 %vm194_vm1, %v665_v33  ;;  %740 = vmatprep.mubr.f32.mxu0 %v1971_v0  ;;  %v994_v39 = vsel %vm992_vm7, %v989_v34, %v991_v31 }
  0xb5   : > { %v830_v36 = vsel %vm828_vm6, %v825_v35, %v827_v24  ;;  %v829_v37 = vsel %vm828_vm6, %v823_v21, %v825_v35 }
  0xb6   : > { %1756 = vmatprep.subr.msk.mxu0 %vm194_vm1, %v830_v36 }
  0xb7   : > { %1752 = vmatmul.mubr.msk.f32.vlgmr.msra.gmra.mxu0 %vm190_vm2, %v1749_v19  ;;  %v987_v38 = vpop.permute.xlu0 %986 }
  0xb8   : > { %v1153_v40 = vpop.permute.xlu1 %1152  ;;  %1757 = vmatpush1.msk.msra.mxu0 %vm194_vm1, %v829_v37  ;;  %904 = vmatprep.mubr.f32.mxu0 %v1971_v0  ;;  %v993_v42 = vsel %vm992_vm7, %v987_v38, %v989_v34 }
  0xb9   : > { %1762 = vmatprep.subr.msk.mxu0 %vm194_vm1, %v994_v39 }
  0xbb   : > { %1758 = vmatmul.mubr.msk.f32.vlgmr.msra.gmra.mxu0 %vm190_vm2, %v1755_v25  ;;  %v1155_v43 = vpop.permute.xlu0 %1154 }
  0xbc   : > { %v1151_v44 = vpop.permute.xlu1 %1150  ;;  %1763 = vmatpush1.msk.msra.mxu0 %vm194_vm1, %v993_v42  ;;  %v1158_v45 = vsel %vm1156_vm8, %v1153_v40, %v1155_v43  ;;  %1837 = vmatpush3.msk.msra.mxu1 %vm194_vm1, %v1155_v43 }
  0xbd   : > { %1768 = vmatprep.subr.msk.mxu0 %vm194_vm1, %v1158_v45  ;;  %1839 = vmatmul.mubr.msk.f32.vlgmr.msra.gmra.mxu1 %vm190_vm2, %v1767_v41  ;;  %v1157_v46 = vsel %vm1156_vm8, %v1151_v44, %v1153_v40 }
  0xbe   : > { %1068 = vmatprep.mubr.f32.mxu0 %v1971_v0  ;;  %1841 = vmatprep.subr.mxu1 %v1971_v0 }
  0xbf   : > { %1764 = vmatmul.mubr.msk.f32.vlgmr.msra.gmra.mxu0 %vm190_vm2, %v1761_v30  ;;  %v1317_v47 = vpop.permute.xlu0 %1316  ;;  %1843 = vmatprep.mubr.msk.f32.mxu1 %vm1972_vm0, %v1971_v0 }
  0xc0   : > { %v1319_v49 = vpop.permute.xlu1 %1318  ;;  %1769 = vmatpush1.msk.msra.mxu0 %vm194_vm1, %v1157_v46  ;;  %1232 = vmatprep.mubr.f32.mxu0 %v1971_v0 }
  0xc1   : > { %v1322_v50 = vsel %vm1320_vm9, %v1317_v47, %v1319_v49  ;;  %1842 = vmatpush3.msk.msra.mxu1 %vm194_vm1, %v1319_v49 }
  0xc2   : > { %1774 = vmatprep.subr.msk.mxu0 %vm194_vm1, %v1322_v50  ;;  %1844 = vmatmul.mubr.msk.f32.vlgmr.msra.gmra.mxu1 %vm190_vm2, %v1773_v48 }
  0xc3   : > { %1770 = vmatmul.mubr.msk.f32.vlgmr.msra.gmra.mxu0 %vm190_vm2, %v1767_v41  ;;  %v1315_v51 = vpop.permute.xlu0 %1314  ;;  %1846 = vmatprep.subr.mxu1 %v1971_v0 }
  0xc4   : > { %v1481_v52 = vpop.permute.xlu1 %1480  ;;  %v1321_v53 = vsel %vm1320_vm9, %v1315_v51, %v1317_v47  ;;  %1396 = vmatprep.mubr.f32.mxu0 %v1971_v0  ;;  %1848 = vmatprep.mubr.msk.f32.mxu1 %vm1972_vm0, %v1971_v0 }
  0xc5   : > { %1775 = vmatpush1.msk.msra.mxu0 %vm194_vm1, %v1321_v53 }
  0xc7   : > { %1776 = vmatmul.mubr.msk.f32.vlgmr.msra.gmra.mxu0 %vm190_vm2, %v1773_v48  ;;  %v1483_v55 = vpop.permute.xlu0 %1482 }
  0xc8   : > { %v1479_v56 = vpop.permute.xlu1 %1478  ;;  %v1486_v57 = vsel %vm1484_vm10, %v1481_v52, %v1483_v55  ;;  %1847 = vmatpush3.msk.msra.mxu1 %vm194_vm1, %v1483_v55  ;;  %1560 = vmatprep.mubr.f32.mxu0 %v1971_v0 }
  0xc9   : > { %v1485_v58 = vsel %vm1484_vm10, %v1479_v56, %v1481_v52  ;;  %1780 = vmatprep.subr.msk.mxu0 %vm194_vm1, %v1486_v57  ;;  %1849 = vmatmul.mubr.msk.f32.vlgmr.msra.gmra.mxu1 %vm190_vm2, %v1779_v54 }
  0xca   : > { %1781 = vmatpush1.msk.msra.mxu0 %vm194_vm1, %v1485_v58 }
  0xcb   : > { %1782 = vmatmul.mubr.msk.f32.vlgmr.msra.gmra.mxu0 %vm190_vm2, %v1779_v54 }
  0xd4   : > { %v1644_v44 = vpop.permute.xlu0 %1643 }
 0x15d   : > { %v338_v59 = vpop.f32.mrf.mxu1 }
 0x15f   : > { %v1810_v60 = vpop.f32.mrf.mxu1 }
 0x161   : > { %v488_v61 = vpop.f32.mrf.mxu1 }
 0x162   : > { %v489_v11 = vadd.f32 %v488_v61, %v338_v59 }
 0x163   : > { %v1815_v62 = vpop.f32.mrf.mxu1 }
 0x165   : > { %v649_v63 = vpop.f32.mrf.mxu1 }
 0x166   : > { %v655_v15 = vadd.f32 %v649_v63, %v489_v11 }
 0x167   : > { %v1820_v1 = vpop.f32.mrf.mxu1 }
 0x169   : > { %v813_v2 = vpop.f32.mrf.mxu1 }
 0x16a   : > { %v819_v18 = vadd.f32 %v813_v2, %v655_v15 }
 0x16b   : > { %v267_v3 = vpop.f32.mrf.mxu0  ;;  %v1825_v4 = vpop.f32.mrf.mxu1 }
 0x16d   : > { %v269_v5 = vpop.f32.mrf.mxu0 }
 0x16e   : > { %v977_v0 = vpop.f32.mrf.mxu1 }
 0x16f   : > { %v417_v6 = vpop.f32.mrf.mxu0  ;;  %v983_v26 = vadd.f32 %v977_v0, %v819_v18 }
 0x170   : > { %v1830_v7 = vpop.f32.mrf.mxu1  ;;  %v418_v21 = vadd.f32 %v417_v6, %v267_v3 }
 0x171   : > { %v419_v8 = vpop.f32.mrf.mxu0 }
 0x172   : > { %v1141_v9 = vpop.f32.mrf.mxu1  ;;  %v420_v24 = vadd.f32 %v419_v8, %v269_v5 }
 0x173   : > { %v578_v10 = vpop.f32.mrf.mxu0  ;;  %v1147_v32 = vadd.f32 %v1141_v9, %v983_v26 }
 0x174   : > { %v1835_v12 = vpop.f32.mrf.mxu1  ;;  %v653_v25 = vadd.f32 %v578_v10, %v418_v21 }
 0x175   : > { %v580_v13 = vpop.f32.mrf.mxu0 }
 0x176   : > { %v654_v28 = vadd.f32 %v580_v13, %v420_v24 }
 0x177   : > { %v742_v14 = vpop.f32.mrf.mxu0 }
 0x178   : > { %v817_v29 = vadd.f32 %v742_v14, %v653_v25 }
 0x179   : > { %v744_v16 = vpop.f32.mrf.mxu0 }
 0x17a   : > { %v818_v33 = vadd.f32 %v744_v16, %v654_v28 }
 0x17b   : > { %v906_v17 = vpop.f32.mrf.mxu0 }
 0x17c   : > { %v981_v34 = vadd.f32 %v906_v17, %v817_v29 }
 0x17d   : > { %v908_v19 = vpop.f32.mrf.mxu0  ;;  %v1305_v20 = vpop.f32.mrf.mxu1 }
 0x17e   : > { %v982_v37 = vadd.f32 %v908_v19, %v818_v33  ;;  %v1311_v38 = vadd.f32 %v1305_v20, %v1147_v32 }
 0x17f   : > { %v1070_v22 = vpop.f32.mrf.mxu0  ;;  %v1840_v23 = vpop.f32.mrf.mxu1 }
 0x180   : > { %v1145_v39 = vadd.f32 %v1070_v22, %v981_v34 }
 0x181   : > { %v1072_v27 = vpop.f32.mrf.mxu0 }
 0x182   : > { %v1469_v30 = vpop.f32.mrf.mxu1  ;;  %v1146_v41 = vadd.f32 %v1072_v27, %v982_v37 }
 0x183   : > { %v1234_v31 = vpop.f32.mrf.mxu0  ;;  %v1475_v42 = vadd.f32 %v1469_v30, %v1311_v38 }
 0x184   : > { %v1845_v35 = vpop.f32.mrf.mxu1  ;;  %v1309_v43 = vadd.f32 %v1234_v31, %v1145_v39 }
 0x185   : > { %v1236_v36 = vpop.f32.mrf.mxu0 }
 0x186   : > { %v1310_v47 = vadd.f32 %v1236_v36, %v1146_v41 }
 0x187   : > { %v1398_v40 = vpop.f32.mrf.mxu0 }
 0x188   : > { %v1473_v48 = vadd.f32 %v1398_v40, %v1309_v43 }
 0x189   : > { %v1400_v45 = vpop.f32.mrf.mxu0  ;;  %v1633_v46 = vpop.f32.mrf.mxu1 }
 0x18a   : > { %v1639_v49 = vadd.f32 %v1633_v46, %v1475_v42  ;;  %v1474_v52 = vadd.f32 %v1400_v45, %v1310_v47 }
 0x18b   : > { %v1562_v50 = vpop.f32.mrf.mxu0  ;;  %v1850_v51 = vpop.f32.mrf.mxu1 }
 0x18c   : > { %v1637_v53 = vadd.f32 %v1562_v50, %v1473_v48  ;;  %v1648_v54 = vsub.f32 %v1644_v44, %v1639_v49 }
 0x18d   : > { %v1564_v55 = vpop.f32.mrf.mxu0 }
 0x18e   : > { %v1646_v56 = vsub.f32 %v1644_v44, %v1637_v53  ;;  %1652 = vst.msk [vmem:[%s163_s24 + $0x10] sm:$0xff] %vm1651_vm11, %v1648_v54  ;;  %v1638_v57 = vadd.f32 %v1564_v55, %v1474_v52 }
 0x190   : > { %1649 = vst [vmem:[%s163_s24] sm:$0xff] %v1646_v56  ;;  %v1647_v58 = vsub.f32 %v1644_v44, %v1638_v57 }
 0x192   : > { %1650 = vst [vmem:[%s163_s24 + $0x8] sm:$0xff] %v1647_v58 }
 0x193   : > { %1922 = shalt.err (!%p1919_p3)
}
 0x194   : > { %s1923_s6 = scalar_lea.hbm %s1666_s28, 384  ;;  %s1927_s9 = scalar_lea.hbm %s2236_s3, 768 }
 0x195   : > { %p1924_p4 = scmp.ne.s32.totalorder %s1666_s28, %s1923_s6  ;;  %p1928_p9 = scmp.lt.s32.totalorder %s1666_s28, %s2236_s3 }
 0x196   : > { %p1929_p10 = scmp.lt.s32.totalorder %s1927_s9, %s1923_s6 }
 0x197   : > { %p1925_p7 = pnand %p1924_p4, %p2041_p5 }
 0x198   : > { %p1930_p11 = por %p1929_p10, %p1928_p9 }
 0x199   : > { %p1926_p8 = pneg %p1925_p7 }
 0x19b   : > { %p1931_p12 = pnand %p1930_p11, %p1926_p8 }
 0x19d   : > { %1934 = shalt.err (!%p1931_p12)
}
 0x19e   : > { %1854 = dma.vmem_to_hbm [thread:$0]  (%p2041_p5), %s1669_s25, 384, %s1666_s28, %s1654_s29  }
 0x19f PF: > { %p1860_p13 = scmp.ge.s32.totalorder %s1969_s15, 2  ;;  %s1680_s17 = sand.u32 1, %s1957_s12  }
 0x1a0   : > { %s1681_s19 = scalar_lea.sflag [#allocation3], %s1680_s17 }
 0x1a1   : > { %p1857_p0 = pnand %p1860_p13, %p2045_p6 }
 0x1a3   : > { %p1858_p1 = pneg %p1857_p0 }
 0x1a5   : > { %1952 = dma.done.wait (%p1858_p1), %s1681_s19, 384  }
 0x1a6   : > { %1954 = vsyncadd (%p1858_p1), %s1681_s19, 4294966912  ;;  %p13_p2 = scmp.ge.s32.totalorder %s2028_s18, 4   ;;  %s2239_s12 = smov %s1961_s13 }
 0x1a7   : > { %s2240_s13 = smov %s1965_s14  ;;  %s2241_s14 = smov %s2039_s21 }
 0x1a8   : > { %s2242_s15 = smov %s2028_s18  ;;  %15 = sbr.rel (!%p13_p2) target bundleno = 3 (0x3), region = 75 }
 0x1ad   :  { %1686 = vsyncpa [#allocation3], 1 }
 0x1ae   :  { %1688 = vsyncpa [#allocation3 + $0x1], 1 }

</bundles_post_ra>
